<compile_context>
chip_gen: v6e
topology: v6e:2x2x1
jax: 0.10.0
libtpu: 0.0.40
codegen_flags: <defaults>
</compile_context>

<pallas_src>
import functools

import jax
import jax.numpy as jnp
from jax import lax
from jax.experimental import pallas as pl
from jax.experimental.pallas import tpu as pltpu


def _round_up(n, m):
    return ((n + m - 1) // m) * m


def _segment_lid_kernel(x_ref, w_ref, b_ref, utt_ref, loss_ref, acc_ref,
                        sum_ref, *, inv_t, inv_b, smooth_val, conf_delta,
                        num_class):
    t = pl.program_id(0)

    @pl.when(t == 0)
    def _():
        sum_ref[...] = jnp.zeros_like(sum_ref)

    # Streaming mean-pool accumulation over the time axis (f32 accumulate,
    # bf16 HBM stream).
    sum_ref[...] += jnp.sum(x_ref[...].astype(jnp.float32), axis=1)

    @pl.when(t == pl.num_programs(0) - 1)
    def _():
        pooled = sum_ref[...] * inv_t                              # (B, D)
        logits = jnp.dot(pooled, w_ref[...],
                         preferred_element_type=jnp.float32) + b_ref[...]

        # log(softmax(logits)) via stable log-softmax.
        m = jnp.max(logits, axis=-1, keepdims=True)
        lse = m + jnp.log(jnp.sum(jnp.exp(logits - m), axis=-1, keepdims=True))
        lsm = logits - lse                                         # (B, C)

        bq, cq = logits.shape
        c_iota = lax.broadcasted_iota(jnp.int32, (bq, cq), 1)

        # First-occurrence argmax (matches torch.max tie-breaking).
        argmax = jnp.min(jnp.where(logits >= m, c_iota, num_class),
                         axis=-1, keepdims=True)                   # (B, 1)
        correct = (argmax == utt_ref[...]).astype(jnp.float32)     # (B, 1)
        acc_ref[...] = jnp.sum(correct, axis=0, keepdims=True) * inv_b

        # Label-smoothed loss:
        #   true_dist = smooth_val everywhere, confidence at the target, so
        #   loss_b = -(smooth_val * sum_c lsm + (conf - smooth_val) * lsm_tgt)
        onehot = c_iota == utt_ref[...]                            # (B, C)
        lsm_tgt = jnp.sum(jnp.where(onehot, lsm, 0.0), axis=-1, keepdims=True)
        loss_b = -(smooth_val * jnp.sum(lsm, axis=-1, keepdims=True)
                   + conf_delta * lsm_tgt)                         # (B, 1)
        loss_ref[...] = (10.0 * inv_b) * jnp.sum(loss_b, axis=0, keepdims=True)


def segment_lid_forward(x, utt_id, weight, bias, *, classes=3, smoothing=0.1,
                        tile_t=256):
    """x: (B,T,D) f32; utt_id: (B,1) int; weight: (C,D); bias: (C,)."""
    B, T, D = x.shape
    C = weight.shape[0]

    w_t = weight.T.astype(jnp.float32)                 # (D, C), pre-transposed
    b2 = bias.reshape(1, C).astype(jnp.float32)
    utt = utt_id.reshape(B, 1).astype(jnp.int32)

    # bf16 stream for the dominant HBM traffic; pad T instead of asserting.
    x_bf = x.astype(jnp.bfloat16)
    tile_t_eff = min(tile_t, _round_up(T, 8))
    t_pad = _round_up(T, tile_t_eff)
    if t_pad != T:
        x_bf = jnp.pad(x_bf, ((0, 0), (0, t_pad - T), (0, 0)))
    grid = (t_pad // tile_t_eff,)

    smooth_val = smoothing / (classes - 1)
    conf_delta = (1.0 - smoothing) - smooth_val

    kernel = functools.partial(
        _segment_lid_kernel,
        inv_t=1.0 / T, inv_b=1.0 / B,
        smooth_val=smooth_val, conf_delta=conf_delta, num_class=C)

    bytes_accessed = (int(x_bf.size) * 2 + int(w_t.size) * 4
                      + int(b2.size) * 4 + int(utt.size) * 4 + 8)

    loss, acc = pl.pallas_call(
        kernel,
        out_shape=(jax.ShapeDtypeStruct((1, 1), jnp.float32),
                   jax.ShapeDtypeStruct((1, 1), jnp.float32)),
        grid=grid,
        in_specs=[
            pl.BlockSpec((B, tile_t_eff, D), lambda t: (0, t, 0)),
            pl.BlockSpec((D, C), lambda t: (0, 0)),
            pl.BlockSpec((1, C), lambda t: (0, 0)),
            pl.BlockSpec((B, 1), lambda t: (0, 0)),
        ],
        out_specs=(pl.BlockSpec((1, 1), lambda t: (0, 0)),
                   pl.BlockSpec((1, 1), lambda t: (0, 0))),
        scratch_shapes=[pltpu.VMEM((B, D), jnp.float32)],
        compiler_params=pltpu.CompilerParams(
            dimension_semantics=("arbitrary",)),
        cost_estimate=pl.CostEstimate(
            flops=2 * B * t_pad * D + 2 * B * D * C,
            transcendentals=B * (C + 1),
            bytes_accessed=bytes_accessed),
    )(x_bf, w_t, b2, utt)

    return loss[0, 0], acc[0, 0]


if __name__ == "__main__":
    B, T, D, C = 8, 160, 128, 3

    key = jax.random.PRNGKey(0)
    kx, kw, kb, ku = jax.random.split(key, 4)

    x = jax.random.normal(kx, (B, T, D), jnp.float32)
    utt_id = jax.random.randint(ku, (B, 1), 0, C, jnp.int32)
    # torch.nn.Linear(input_size=D, num_class=C): weight (C, D), bias (C,)
    weight = jax.random.normal(kw, (C, D), jnp.float32) * (1.0 / jnp.sqrt(D))
    bias = jax.random.normal(kb, (C,), jnp.float32) * 0.01

    loss, acc = segment_lid_forward(x, utt_id, weight, bias, tile_t=64)
    loss, acc = jax.block_until_ready((loss, acc))

    # Pure-JAX f32 reference for a sanity check on the (smooth) loss value.
    pooled = jnp.mean(x, axis=1)
    logits = pooled @ weight.T + bias
    lsm = jax.nn.log_softmax(logits, axis=-1)
    tgt = utt_id[:, 0]
    true_dist = jnp.full((B, C), 0.1 / 2.0,
                         jnp.float32).at[jnp.arange(B), tgt].set(0.9)
    ref_loss = 10.0 * jnp.mean(jnp.sum(-true_dist * lsm, axis=-1))

    assert bool(jnp.isfinite(loss)) and bool(jnp.isfinite(acc))
    assert 0.0 <= float(acc) <= 1.0
    assert abs(float(loss) - float(ref_loss)) < 5e-2 * max(1.0, abs(float(ref_loss)))
    print("KERNEL_OK")
</pallas_src>

<mosaic_0001>
module attributes {stable_mosaic.version = 11 : i64} {
  func.func @_segment_lid_kernel(%arg0: i32, %arg1: memref<8x64x128xbf16, #tpu.memory_space<vmem>>, %arg2: memref<128x3xf32, #tpu.memory_space<vmem>>, %arg3: memref<1x3xf32, #tpu.memory_space<vmem>>, %arg4: memref<8x1xi32, #tpu.memory_space<vmem>>, %arg5: memref<1x1xf32, #tpu.memory_space<vmem>>, %arg6: memref<1x1xf32, #tpu.memory_space<vmem>>, %arg7: memref<8x128xf32, #tpu.memory_space<vmem>>) attributes {dimension_semantics = [#tpu.dimension_semantics<arbitrary>], iteration_bounds = array<i64: 3>, scalar_prefetch = 0 : i64, scratch_operands = 1 : i64, tpu.core_type = #tpu.core_type<tc>, window_params = [{transform_indices = @transform_0, window_bounds = array<i64: 8, 64, 128>}, {pipeline_mode = #tpu.pipeline_mode<synchronous>, transform_indices = @transform_1, window_bounds = array<i64: 128, 3>}, {pipeline_mode = #tpu.pipeline_mode<synchronous>, transform_indices = @transform_2, window_bounds = array<i64: 1, 3>}, {pipeline_mode = #tpu.pipeline_mode<synchronous>, transform_indices = @transform_3, window_bounds = array<i64: 8, 1>}, {pipeline_mode = #tpu.pipeline_mode<synchronous>, transform_indices = @transform_4, window_bounds = array<i64: 1, 1>}, {pipeline_mode = #tpu.pipeline_mode<synchronous>, transform_indices = @transform_5, window_bounds = array<i64: 1, 1>}]} {
    %c0_i32 = arith.constant 0 : i32
    %0 = arith.cmpi eq, %arg0, %c0_i32 : i32
    %1 = arith.extui %0 : i1 to i32
    %c0_i32_0 = arith.constant 0 : i32
    %2 = arith.cmpi ne, %1, %c0_i32_0 : i32
    scf.if %2 {
      %cst_8 = arith.constant 0.000000e+00 : f32
      %12 = vector.broadcast %cst_8 : f32 to vector<8x128xf32>
      %c0_9 = arith.constant 0 : index
      %c0_10 = arith.constant 0 : index
      %13 = vector.load %arg7[%c0_9, %c0_10] : memref<8x128xf32, #tpu.memory_space<vmem>>, vector<8x128xf32>
      tpu.vector_store %arg7[%c0_9, %c0_10], %12 {strides = array<i32>} : memref<8x128xf32, #tpu.memory_space<vmem>>, vector<8x128xf32>,
    } else {
    }
    %c0 = arith.constant 0 : index
    %c0_1 = arith.constant 0 : index
    %3 = vector.load %arg7[%c0, %c0_1] : memref<8x128xf32, #tpu.memory_space<vmem>>, vector<8x128xf32>
    %c0_2 = arith.constant 0 : index
    %c0_3 = arith.constant 0 : index
    %c0_4 = arith.constant 0 : index
    %4 = vector.load %arg1[%c0_2, %c0_3, %c0_4] : memref<8x64x128xbf16, #tpu.memory_space<vmem>>, vector<8x64x128xbf16>
    %5 = arith.extf %4 : vector<8x64x128xbf16> to vector<8x64x128xf32>
    %cst = arith.constant dense<0.000000e+00> : vector<8x128xf32>
    %6 = vector.multi_reduction <add>, %5, %cst [1] : vector<8x64x128xf32> to vector<8x128xf32>
    %7 = arith.addf %3, %6 : vector<8x128xf32>
    %c0_5 = arith.constant 0 : index
    %c0_6 = arith.constant 0 : index
    %8 = vector.load %arg7[%c0_5, %c0_6] : memref<8x128xf32, #tpu.memory_space<vmem>>, vector<8x128xf32>
    tpu.vector_store %arg7[%c0_5, %c0_6], %7 {strides = array<i32>} : memref<8x128xf32, #tpu.memory_space<vmem>>, vector<8x128xf32>,
    %c2_i32 = arith.constant 2 : i32
    %9 = arith.cmpi eq, %arg0, %c2_i32 : i32
    %10 = arith.extui %9 : i1 to i32
    %c0_i32_7 = arith.constant 0 : i32
    %11 = arith.cmpi ne, %10, %c0_i32_7 : i32
    scf.if %11 {
      %c0_8 = arith.constant 0 : index
      %c0_9 = arith.constant 0 : index
      %12 = vector.load %arg7[%c0_8, %c0_9] : memref<8x128xf32, #tpu.memory_space<vmem>>, vector<8x128xf32>
      %cst_10 = arith.constant 6.250000e-03 : f32
      %13 = vector.broadcast %cst_10 : f32 to vector<8x128xf32>
      %14 = arith.mulf %12, %13 : vector<8x128xf32>
      %c0_11 = arith.constant 0 : index
      %c0_12 = arith.constant 0 : index
      %15 = vector.load %arg2[%c0_11, %c0_12] : memref<128x3xf32, #tpu.memory_space<vmem>>, vector<128x3xf32>
      %cst_13 = arith.constant dense<0.000000e+00> : vector<8x3xf32>
      %16 = tpu.matmul %14, %15, %cst_13 {dimension_numbers = #tpu.dot_dimension_numbers<[1], [0], [0], [1], [0, 0, 1, 1], [], []>} : vector<8x128xf32>, vector<128x3xf32>, vector<8x3xf32> -> vector<8x3xf32>
      %c0_14 = arith.constant 0 : index
      %c0_15 = arith.constant 0 : index
      %17 = vector.load %arg3[%c0_14, %c0_15] : memref<1x3xf32, #tpu.memory_space<vmem>>, vector<1x3xf32>
      %18 = vector.broadcast %17 : vector<1x3xf32> to vector<8x3xf32>
      %19 = arith.addf %16, %18 : vector<8x3xf32>
      %cst_16 = arith.constant dense<0xFF800000> : vector<8xf32>
      %20 = vector.multi_reduction <maximumf>, %19, %cst_16 [1] : vector<8x3xf32> to vector<8xf32>
      %21 = vector.shape_cast %20 : vector<8xf32> to vector<8x1xf32>
      %22 = vector.broadcast %21 : vector<8x1xf32> to vector<8x3xf32>
      %23 = arith.subf %19, %22 : vector<8x3xf32>
      %24 = math.exp %23 : vector<8x3xf32>
      %cst_17 = arith.constant dense<0.000000e+00> : vector<8xf32>
      %25 = vector.multi_reduction <add>, %24, %cst_17 [1] : vector<8x3xf32> to vector<8xf32>
      %26 = vector.shape_cast %25 : vector<8xf32> to vector<8x1xf32>
      %27 = math.log %26 : vector<8x1xf32>
      %28 = arith.addf %21, %27 : vector<8x1xf32>
      %29 = vector.broadcast %28 : vector<8x1xf32> to vector<8x3xf32>
      %30 = arith.subf %19, %29 : vector<8x3xf32>
      %31 = tpu.iota {dimensions = array<i32: 1>} : vector<8x3xi32>
      %32 = vector.broadcast %21 : vector<8x1xf32> to vector<8x3xf32>
      %33 = arith.cmpf oge, %19, %32 : vector<8x3xf32>
      %c3_i32 = arith.constant 3 : i32
      %34 = vector.broadcast %c3_i32 : i32 to vector<8x3xi32>
      %35 = arith.select %33, %31, %34 : vector<8x3xi1>, vector<8x3xi32>
      %cst_18 = arith.constant dense<2147483647> : vector<8xi32>
      %36 = vector.multi_reduction <minsi>, %35, %cst_18 [1] : vector<8x3xi32> to vector<8xi32>
      %37 = vector.shape_cast %36 : vector<8xi32> to vector<8x1xi32>
      %c0_19 = arith.constant 0 : index
      %c0_20 = arith.constant 0 : index
      %38 = vector.load %arg4[%c0_19, %c0_20] : memref<8x1xi32, #tpu.memory_space<vmem>>, vector<8x1xi32>
      %39 = arith.cmpi eq, %37, %38 : vector<8x1xi32>
      %40 = arith.extui %39 : vector<8x1xi1> to vector<8x1xi32>
      %41 = arith.sitofp %40 : vector<8x1xi32> to vector<8x1xf32>
      %cst_21 = arith.constant dense<0.000000e+00> : vector<1xf32>
      %42 = vector.multi_reduction <add>, %41, %cst_21 [0] : vector<8x1xf32> to vector<1xf32>
      %43 = vector.shape_cast %42 : vector<1xf32> to vector<1x1xf32>
      %cst_22 = arith.constant 1.250000e-01 : f32
      %44 = vector.broadcast %cst_22 : f32 to vector<1x1xf32>
      %45 = arith.mulf %43, %44 : vector<1x1xf32>
      %c0_23 = arith.constant 0 : index
      %c0_24 = arith.constant 0 : index
      %46 = vector.load %arg6[%c0_23, %c0_24] : memref<1x1xf32, #tpu.memory_space<vmem>>, vector<1x1xf32>
      tpu.vector_store %arg6[%c0_23, %c0_24], %45 {strides = array<i32>} : memref<1x1xf32, #tpu.memory_space<vmem>>, vector<1x1xf32>,
      %c0_25 = arith.constant 0 : index
      %c0_26 = arith.constant 0 : index
      %47 = vector.load %arg4[%c0_25, %c0_26] : memref<8x1xi32, #tpu.memory_space<vmem>>, vector<8x1xi32>
      %48 = vector.broadcast %47 : vector<8x1xi32> to vector<8x3xi32>
      %49 = arith.cmpi eq, %31, %48 : vector<8x3xi32>
      %cst_27 = arith.constant 0.000000e+00 : f32
      %50 = vector.broadcast %cst_27 : f32 to vector<8x3xf32>
      %51 = arith.select %49, %30, %50 : vector<8x3xi1>, vector<8x3xf32>
      %cst_28 = arith.constant dense<0.000000e+00> : vector<8xf32>
      %52 = vector.multi_reduction <add>, %51, %cst_28 [1] : vector<8x3xf32> to vector<8xf32>
      %53 = vector.shape_cast %52 : vector<8xf32> to vector<8x1xf32>
      %cst_29 = arith.constant dense<0.000000e+00> : vector<8xf32>
      %54 = vector.multi_reduction <add>, %30, %cst_29 [1] : vector<8x3xf32> to vector<8xf32>
      %55 = vector.shape_cast %54 : vector<8xf32> to vector<8x1xf32>
      %cst_30 = arith.constant 5.000000e-02 : f32
      %56 = vector.broadcast %cst_30 : f32 to vector<8x1xf32>
      %57 = arith.mulf %56, %55 : vector<8x1xf32>
      %cst_31 = arith.constant 8.500000e-01 : f32
      %58 = vector.broadcast %cst_31 : f32 to vector<8x1xf32>
      %59 = arith.mulf %58, %53 : vector<8x1xf32>
      %60 = arith.addf %57, %59 : vector<8x1xf32>
      %cst_32 = arith.constant 0.000000e+00 : f32
      %61 = vector.broadcast %cst_32 : f32 to vector<8x1xf32>
      %62 = arith.subf %61, %60 : vector<8x1xf32>
      %cst_33 = arith.constant dense<0.000000e+00> : vector<1xf32>
      %63 = vector.multi_reduction <add>, %62, %cst_33 [0] : vector<8x1xf32> to vector<1xf32>
      %64 = vector.shape_cast %63 : vector<1xf32> to vector<1x1xf32>
      %cst_34 = arith.constant 1.250000e+00 : f32
      %65 = vector.broadcast %cst_34 : f32 to vector<1x1xf32>
      %66 = arith.mulf %65, %64 : vector<1x1xf32>
      %c0_35 = arith.constant 0 : index
      %c0_36 = arith.constant 0 : index
      %67 = vector.load %arg5[%c0_35, %c0_36] : memref<1x1xf32, #tpu.memory_space<vmem>>, vector<1x1xf32>
      tpu.vector_store %arg5[%c0_35, %c0_36], %66 {strides = array<i32>} : memref<1x1xf32, #tpu.memory_space<vmem>>, vector<1x1xf32>,
    } else {
    }
    return
  }
  func.func @transform_0(%arg0: i32) -> (i32, i32, i32) {
    %c0_i32 = arith.constant 0 : i32
    %c0_i32_0 = arith.constant 0 : i32
    %c0_i32_1 = arith.constant 0 : i32
    return %c0_i32, %arg0, %c0_i32_0 : i32, i32, i32
  }
  func.func @transform_1(%arg0: i32) -> (i32, i32) {
    %c0_i32 = arith.constant 0 : i32
    %c0_i32_0 = arith.constant 0 : i32
    %c0_i32_1 = arith.constant 0 : i32
    return %c0_i32, %c0_i32_0 : i32, i32
  }
  func.func @transform_2(%arg0: i32) -> (i32, i32) {
    %c0_i32 = arith.constant 0 : i32
    %c0_i32_0 = arith.constant 0 : i32
    %c0_i32_1 = arith.constant 0 : i32
    return %c0_i32, %c0_i32_0 : i32, i32
  }
  func.func @transform_3(%arg0: i32) -> (i32, i32) {
    %c0_i32 = arith.constant 0 : i32
    %c0_i32_0 = arith.constant 0 : i32
    %c0_i32_1 = arith.constant 0 : i32
    return %c0_i32, %c0_i32_0 : i32, i32
  }
  func.func @transform_4(%arg0: i32) -> (i32, i32) {
    %c0_i32 = arith.constant 0 : i32
    %c0_i32_0 = arith.constant 0 : i32
    %c0_i32_1 = arith.constant 0 : i32
    return %c0_i32, %c0_i32_0 : i32, i32
  }
  func.func @transform_5(%arg0: i32) -> (i32, i32) {
    %c0_i32 = arith.constant 0 : i32
    %c0_i32_0 = arith.constant 0 : i32
    %c0_i32_1 = arith.constant 0 : i32
    return %c0_i32, %c0_i32_0 : i32, i32
  }
}

</mosaic_0001>

<bundles_post_ra>
// kernel: tpu_custom_call.1
= control target key start
LH: loop header
LB: loop body
LE: loop exit
PB: predicated region body
PF: predicated region fallthrough
CT: control target
= control target key end

     0   :  { %11 = vsyncpa [#allocation4], 0  ;;  %s1605_s0 = inlined_call_operand.hbm [shape: bf16[8,192,128], index: 0, kind: input, shape index: {}]   ;;  %s1606_s1 = inlined_call_operand.vmem [shape: f32[128,3], index: 1, kind: input, shape index: {}]   ;;  %s1607_s2 = inlined_call_operand.vmem [shape: f32[1,3], index: 2, kind: input, shape index: {}]   ;;  %s1608_s3 = inlined_call_operand.vmem [shape: s32[8,1], index: 3, kind: input, shape index: {}]   ;;  %s1609_s4 = inlined_call_operand.hbm [shape: f32[1,1], index: 4, kind: output, shape index: {0}]   ;;  %s1610_s5 = inlined_call_operand.hbm [shape: f32[1,1], index: 5, kind: output, shape index: {1}]  }
   0x1   :  { %13 = vsyncpa [#allocation4 + $0x1], 0 }
   0x2   :  { %14 = vsyncpa [#allocation5], 0 }
   0x3   :  { %15 = vsyncpa [#allocation8], 0  ;;  %s1206_s18 = smov 0   ;;  %s1208_s19 = smov 0  }
   0x4   :  { %s1210_s20 = smov 0   ;;  %s1212_s21 = smov 0  }
   0x5 LB: > { %s1225_s22 = sadd.s32 4294967295, %s1162_s21   ;;  %s1228_s23 = sadd.s32 1, %s1162_s21   ;;  %s1162_s21 = sphi %s1212_s21, %s1644_s21   ;;  %s1158_s20 = sphi %s1210_s20, %s1643_s20   ;;  %s1154_s19 = sphi %s1208_s19, %s1642_s19   ;;  %s1150_s18 = sphi %s1206_s18, %s1641_s18  }
   0x6   : > { %s25_s24 = ssub.s32 %s1162_s21, %s1228_s23  ;;  %s28_s25 = sadd.s32 1, %s1158_s20 }
   0x7   : > { %p26_p0 = scmp.eq.s32.totalorder %s25_s24, 0  ;;  %p35_p1 = scmp.ne.s32.totalorder %s1158_s20, %s1154_s19 }
   0x8   : > { %p36_p2 = scmp.eq.s32.totalorder %s1162_s21, 0  ;;  %p41_p3 = scmp.ne.s32.totalorder %s1154_s19, %s1150_s18 }
   0x9   : > { %s1238_s26 = scalar_select %p26_p0, %s1158_s20, %s28_s25  }
   0xa   : > { %p1240_p4 = por %p36_p2, %p35_p1  ;;  %p42_p5 = scmp.eq.s32.totalorder %s1225_s22, 0 }
   0xb   : > { %p771_p7 = scmp.ge.s32.totalorder %s1162_s21, 3 }
   0xc   : > { %p1245_p6 = por %p42_p5, %p41_p3 }
   0xd   : > { %175 = sbr.rel (%p771_p7) target bundleno = 31 (0x1f), region = 28 }
  0x12   : > { %s179_s29 = sand.u32 1, %s1158_s20   ;;  %s789_s30 = sshll.u32 %s1162_s21, 9 }
  0x13   : > { %s772_s6 = sshll.u32 %s179_s29, 8  ;;  %s189_s9 = scalar_lea.hbm %s1605_s0, %s789_s30 }
  0x14   : > { %s1001_s10 = scalar_select %p1240_p4, [#allocation0], [#allocation11] }
  0x15   : > { %s183_s11 = scalar_lea.vmem [#allocation3], %s772_s6  ;;  %s1164_s14 = smov 1536  }
  0x16   : > { %s202_s12 = sshll.u32 %s183_s11, 4  ;;  %s194_s13 = sld [smem:[%s1001_s10]]   ;;  %s203_s12 = int_to_ptr.vmem [resolvable:$true] %s202_s12 }
  0x17   : > { %1002 = sst [smem:[#allocation10]] (%p1240_p4), %s1164_s14  ;;  %s1165_s15 = smov 512  }
  0x18   : > { %1003 = sst [smem:[#allocation10 + $0x1]] (%p1240_p4), %s1165_s15  ;;  %s1166_s16 = smov 8  }
  0x19   : > { %1004 = sst [smem:[#allocation10 + $0x2]] (%p1240_p4), %s1166_s16  ;;  %s1167_s17 = smov 64  }
  0x1a   : > { %1005 = sst [smem:[#allocation10 + $0x3]] (%p1240_p4), %s1167_s17  ;;  %s1168_s24 = smov 4  }
  0x1b   : > { %1006 = sst [smem:[#allocation10 + $0x4]] (%p1240_p4), %s1167_s17  ;;  %s180_s30 = scalar_lea.sflag [#allocation4], %s179_s29 }
  0x1c   : > { %s775_s18 = sshll.u32 %s194_s13, 26  ;;  %1007 = sst [smem:[#allocation10 + $0x5]] (%p1240_p4), %s1168_s24 }
  0x1d   : > { %s776_s25 = sadd.s32 134217728, %s775_s18  ;;  %s1169_s6 = smov 131072  }
  0x1e   : > { %1008 = dma.general (%p1240_p4), %s189_s9, 4096, %s203_s12, %s180_s30, %s1169_s6, [#allocation10], %s776_s25, 0  }
  0x1f PF: > { %p777_p8 = scmp.ge.s32.totalorder %s1162_s21, 1  ;;  %p223_p9 = scmp.lt.s32.totalorder %s1162_s21, 4 }
  0x21   : > { %p224_p10 = pnand %p777_p8, %p223_p9 }
  0x22   : > { %s229_s7 = sand.u32 (!%p224_p10), 1, %s1154_s19  }
  0x23   : > { %227 = sbr.rel (%p224_p10) target bundleno = 842 (0x34a), region = 36  ;;  %s778_s8 = sshll.u32 (!%p224_p10), %s229_s7, 8 }
  0x24   : > { %s230_s10 = scalar_lea.sflag (!%p224_p10), [#allocation4], %s229_s7  ;;  %s1274_s11 = scalar_lea.vmem (!%p224_p10), [#allocation3], %s778_s8 }
  0x28   : > { %1137 = dma.done.wait (%p1245_p6), %s230_s10, 4096  }
  0x29   : > { %1139 = vsyncadd (%p1245_p6), %s230_s10, 4294963200  ;;  %p779_p11 = scmp.ne.s32.totalorder %s1225_s22, 0 }
  0x2b   : > { %259 = sbr.rel (%p779_p11) target bundleno = 50 (0x32), region = 44 }
  0x30   : > { %v1170_v0 = vmov 0.0  }
  0x31   : > { %260 = vst [vmem:[#allocation2] sm:$0xff] %v1170_v0 }
  0x32 PF: > { %v1282_v1 = vld [vmem:[%s1274_s11] sm:$0xff]   ;;  %v1285_v2 = vld [vmem:[%s1274_s11 + $0x8] sm:$0xff]   ;;  %v1292_v7 = vld [vmem:[%s1274_s11 + $0x10] sm:$0xff]   ;;  %vm502_vm0 = vcmask 1041409   ;;  %vm504_vm1 = vcmask 1042434   ;;  %vm506_vm2 = vcmask 1043459  }
  0x33   : > { %v792_v3 = vunpack.c.l.bf16 %v1282_v1  ;;  %v793_v4 = vunpack.c.h.bf16 %v1282_v1  ;;  %v796_v5 = vunpack.c.l.bf16 %v1285_v2  ;;  %v1295_v8 = vld [vmem:[%s1274_s11 + $0x18] sm:$0xff]   ;;  %v1298_v9 = vld [vmem:[%s1274_s11 + $0x20] sm:$0xff]   ;;  %v1305_v14 = vld [vmem:[%s1274_s11 + $0x28] sm:$0xff]   ;;  %vm508_vm3 = vcmask 1044484   ;;  %p780_p12 = scmp.ne.s32.totalorder %s1225_s22, 2 }
  0x34   : > { %v1308_v15 = vld [vmem:[%s1274_s11 + $0x30] sm:$0xff]   ;;  %v1311_v16 = vld [vmem:[%s1274_s11 + $0x38] sm:$0xff]   ;;  %v808_v17 = vunpack.c.l.bf16 %v1298_v9  ;;  %v809_v18 = vunpack.c.h.bf16 %v1298_v9  ;;  %v812_v19 = vunpack.c.l.bf16 %v1305_v14  ;;  %v1318_v21 = vld [vmem:[%s1274_s11 + $0x40] sm:$0xff]   ;;  %vm510_vm4 = vcmask 1045509  }
  0x35   : > { %v1321_v22 = vld [vmem:[%s1274_s11 + $0x48] sm:$0xff]   ;;  %v1324_v23 = vld [vmem:[%s1274_s11 + $0x50] sm:$0xff]   ;;  %v1331_v28 = vld [vmem:[%s1274_s11 + $0x58] sm:$0xff]   ;;  %v824_v31 = vunpack.c.l.bf16 %v1318_v21  ;;  %v825_v32 = vunpack.c.h.bf16 %v1318_v21  ;;  %v390_v20 = vadd.f32 %v793_v4, %v792_v3  ;;  %vm512_vm5 = vcmask 1046534  }
  0x36   : > { %v1334_v29 = vld [vmem:[%s1274_s11 + $0x60] sm:$0xff]   ;;  %v1337_v30 = vld [vmem:[%s1274_s11 + $0x68] sm:$0xff]   ;;  %v828_v33 = vunpack.c.l.bf16 %v1321_v22  ;;  %v1344_v35 = vld [vmem:[%s1274_s11 + $0x70] sm:$0xff]   ;;  %vm514_vm6 = vcmask 1047559  }
  0x37   : > { %v1347_v36 = vld [vmem:[%s1274_s11 + $0x78] sm:$0xff]   ;;  %v933_v41 = vld [vmem:[%s1274_s11 + $0x80] sm:$0xff]   ;;  %v1355_v42 = vld [vmem:[%s1274_s11 + $0x88] sm:$0xff]   ;;  %v840_v43 = vunpack.c.l.bf16 %v1334_v29  ;;  %v841_v44 = vunpack.c.h.bf16 %v1334_v29  ;;  %v391_v45 = vadd.f32 %v796_v5, %v390_v20  ;;  %v1613_v4 = vunpack.c.l.bf16 %v1337_v30 }
  0x38   : > { %v1362_v47 = vld [vmem:[%s1274_s11 + $0x90] sm:$0xff]   ;;  %v1365_v48 = vld [vmem:[%s1274_s11 + $0x98] sm:$0xff]   ;;  %v937_v53 = vld [vmem:[%s1274_s11 + $0xa0] sm:$0xff]   ;;  %v856_v55 = vunpack.c.l.bf16 %v933_v41  ;;  %v857_v56 = vunpack.c.h.bf16 %v933_v41  ;;  %v860_v57 = vunpack.c.l.bf16 %v1355_v42  ;;  %v861_v58 = vunpack.c.h.bf16 %v1355_v42 }
  0x39   : > { %v1373_v54 = vld [vmem:[%s1274_s11 + $0xa8] sm:$0xff]   ;;  %v1378_v59 = vld [vmem:[%s1274_s11 + $0xb0] sm:$0xff]   ;;  %v1381_v60 = vld [vmem:[%s1274_s11 + $0xb8] sm:$0xff]   ;;  %v872_v52 = vunpack.c.l.bf16 %v937_v53  ;;  %v873_v40 = vunpack.c.h.bf16 %v937_v53  ;;  %v1616_v5 = vunpack.c.h.bf16 %v1321_v22 }
  0x3a   : > { %v941_v29 = vld [vmem:[%s1274_s11 + $0xc0] sm:$0xff]   ;;  %v942_v41 = vld [vmem:[%s1274_s11 + $0xc8] sm:$0xff]   ;;  %v876_v42 = vunpack.c.l.bf16 %v1373_v54  ;;  %v877_v27 = vunpack.c.h.bf16 %v1373_v54  ;;  %v1392_v13 = vld [vmem:[%s1274_s11 + $0xd0] sm:$0xff]   ;;  %v880_v39 = vunpack.c.l.bf16 %v1378_v59  ;;  %v881_v63 = vunpack.c.h.bf16 %v1378_v59 }
  0x3b   : > { %v1395_v51 = vld [vmem:[%s1274_s11 + $0xd8] sm:$0xff]   ;;  %v945_v12 = vld [vmem:[%s1274_s11 + $0xe0] sm:$0xff]   ;;  %v946_v62 = vld [vmem:[%s1274_s11 + $0xe8] sm:$0xff]   ;;  %v888_v53 = vunpack.c.l.bf16 %v941_v29  ;;  %v889_v50 = vunpack.c.h.bf16 %v941_v29  ;;  %v892_v38 = vunpack.c.l.bf16 %v942_v41  ;;  %v893_v25 = vunpack.c.h.bf16 %v942_v41 }
  0x3c   : > { %v947_v11 = vld [vmem:[%s1274_s11 + $0xf0] sm:$0xff]   ;;  %v1405_v54 = vld [vmem:[%s1274_s11 + $0xf8] sm:$0xff]   ;;  %v896_v61 = vunpack.c.l.bf16 %v1392_v13  ;;  %v897_v49 = vunpack.c.h.bf16 %v1392_v13  ;;  %v900_v37 = vunpack.c.l.bf16 %v1395_v51  ;;  %v904_v0 = vunpack.c.l.bf16 %v945_v12 }
  0x3d   : > { %v905_v24 = vunpack.c.h.bf16 %v945_v12  ;;  %v908_v26 = vunpack.c.l.bf16 %v946_v62  ;;  %v909_v10 = vunpack.c.h.bf16 %v946_v62  ;;  %v912_v46 = vunpack.c.l.bf16 %v947_v11 }
  0x3e   : > { %v913_v34 = vunpack.c.h.bf16 %v947_v11  ;;  %v916_v29 = vunpack.c.l.bf16 %v1405_v54  ;;  %v917_v41 = vunpack.c.h.bf16 %v1405_v54  ;;  %v403_v13 = vadd.f32 %v809_v18, %v808_v17 }
  0x3f   : > { %v416_v12 = vadd.f32 %v825_v32, %v824_v31  ;;  %v429_v11 = vadd.f32 %v841_v44, %v840_v43  ;;  %v442_v62 = vadd.f32 %v857_v56, %v856_v55  ;;  %v455_v59 = vadd.f32 %v873_v40, %v872_v52 }
  0x40   : > { %v468_v6 = vadd.f32 %v889_v50, %v888_v53  ;;  %v481_v54 = vadd.f32 %v905_v24, %v904_v0  ;;  %v404_v1 = vadd.f32 %v812_v19, %v403_v13  ;;  %v1614_v32 = vunpack.c.h.bf16 %v1285_v2 }
  0x41   : > { %v417_v3 = vadd.f32 %v828_v33, %v416_v12  ;;  %v430_v9 = vadd.f32 %v1613_v4, %v429_v11  ;;  %v443_v17 = vadd.f32 %v860_v57, %v442_v62  ;;  %v456_v18 = vadd.f32 %v876_v42, %v455_v59 }
  0x42   : > { %v469_v21 = vadd.f32 %v892_v38, %v468_v6  ;;  %v482_v31 = vadd.f32 %v908_v26, %v481_v54  ;;  %v392_v40 = vadd.f32 %v1614_v32, %v391_v45  ;;  %v1615_v24 = vunpack.c.h.bf16 %v1305_v14 }
  0x43   : > { %v418_v20 = vadd.f32 %v1616_v5, %v417_v3  ;;  %v1617_v19 = vunpack.c.h.bf16 %v1337_v30  ;;  %v444_v33 = vadd.f32 %v861_v58, %v443_v17  ;;  %v457_v50 = vadd.f32 %v877_v27, %v456_v18 }
  0x44   : > { %v405_v43 = vadd.f32 %v1615_v24, %v404_v1  ;;  %v470_v52 = vadd.f32 %v893_v25, %v469_v21  ;;  %v483_v55 = vadd.f32 %v909_v10, %v482_v31  ;;  %v1618_v56 = vunpack.c.l.bf16 %v1292_v7 }
  0x45   : > { %v431_v44 = vadd.f32 %v1617_v19, %v430_v9  ;;  %v1619_v26 = vunpack.c.l.bf16 %v1308_v15  ;;  %v1620_v38 = vunpack.c.l.bf16 %v1324_v23  ;;  %v1621_v45 = vunpack.c.l.bf16 %v1344_v35 }
  0x46   : > { %v393_v6 = vadd.f32 %v1618_v56, %v392_v40  ;;  %v1622_v57 = vunpack.c.l.bf16 %v1362_v47  ;;  %v458_v0 = vadd.f32 %v880_v39, %v457_v50  ;;  %v471_v58 = vadd.f32 %v896_v61, %v470_v52 }
  0x47   : > { %v406_v2 = vadd.f32 %v1619_v26, %v405_v43  ;;  %v419_v14 = vadd.f32 %v1620_v38, %v418_v20  ;;  %v432_v22 = vadd.f32 %v1621_v45, %v431_v44  ;;  %v484_v27 = vadd.f32 %v912_v46, %v483_v55 }
  0x48   : > { %v445_v30 = vadd.f32 %v1622_v57, %v444_v33  ;;  %v1623_v10 = vunpack.c.h.bf16 %v1292_v7  ;;  %v1624_v42 = vunpack.c.h.bf16 %v1308_v15  ;;  %v1625_v59 = vunpack.c.h.bf16 %v1324_v23 }
  0x49   : > { %v1626_v12 = vunpack.c.h.bf16 %v1344_v35  ;;  %v1627_v62 = vunpack.c.h.bf16 %v1362_v47  ;;  %v459_v1 = vadd.f32 %v881_v63, %v458_v0  ;;  %v472_v3 = vadd.f32 %v897_v49, %v471_v58 }
  0x4a   : > { %v394_v25 = vadd.f32 %v1623_v10, %v393_v6  ;;  %v407_v53 = vadd.f32 %v1624_v42, %v406_v2  ;;  %v420_v13 = vadd.f32 %v1625_v59, %v419_v14  ;;  %v485_v39 = vadd.f32 %v913_v34, %v484_v27 }
  0x4b   : > { %v433_v11 = vadd.f32 %v1626_v12, %v432_v22  ;;  %v446_v54 = vadd.f32 %v1627_v62, %v445_v30  ;;  %v1628_v46 = vunpack.c.l.bf16 %v1295_v8  ;;  %v1629_v7 = vunpack.c.l.bf16 %v1311_v16 }
  0x4c   : > { %v1630_v15 = vunpack.c.l.bf16 %v1331_v28  ;;  %v1631_v23 = vunpack.c.l.bf16 %v1347_v36  ;;  %v1632_v35 = vunpack.c.l.bf16 %v1365_v48  ;;  %v1633_v47 = vunpack.c.l.bf16 %v1381_v60 }
  0x4d   : > { %v395_v61 = vadd.f32 %v1628_v46, %v394_v25  ;;  %v408_v4 = vadd.f32 %v1629_v7, %v407_v53  ;;  %v473_v49 = vadd.f32 %v900_v37, %v472_v3  ;;  %v486_v34 = vadd.f32 %v916_v29, %v485_v39 }
  0x4e   : > { %v421_v9 = vadd.f32 %v1630_v15, %v420_v13  ;;  %v434_v17 = vadd.f32 %v1631_v23, %v433_v11  ;;  %v447_v18 = vadd.f32 %v1632_v35, %v446_v54  ;;  %v460_v63 = vadd.f32 %v1633_v47, %v459_v1 }
  0x4f   : > { %v1634_v21 = vunpack.c.h.bf16 %v1295_v8  ;;  %v1635_v32 = vunpack.c.h.bf16 %v1311_v16  ;;  %v1636_v24 = vunpack.c.h.bf16 %v1331_v28  ;;  %v1637_v5 = vunpack.c.h.bf16 %v1347_v36 }
  0x50   : > { %v1638_v19 = vunpack.c.h.bf16 %v1365_v48  ;;  %v1639_v33 = vunpack.c.h.bf16 %v1381_v60  ;;  %v1640_v37 = vunpack.c.h.bf16 %v1395_v51  ;;  %v487_v8 = vadd.f32 %v917_v41, %v486_v34 }
  0x51   : > { %v396_v31 = vadd.f32 %v1634_v21, %v395_v61  ;;  %v409_v40 = vadd.f32 %v1635_v32, %v408_v4  ;;  %v422_v43 = vadd.f32 %v1636_v24, %v421_v9  ;;  %v435_v20 = vadd.f32 %v1637_v5, %v434_v17 }
  0x52   : > { %v448_v44 = vadd.f32 %v1638_v19, %v447_v18  ;;  %v461_v50 = vadd.f32 %v1639_v33, %v460_v63  ;;  %v474_v29 = vadd.f32 %v1640_v37, %v473_v49  ;;  %v488_v2 = vrot.slane %v487_v8, 4 }
  0x53   : > { %v397_v52 = vrot.slane %v396_v31, 4  ;;  %v410_v55 = vrot.slane %v409_v40, 4  ;;  %v423_v16 = vrot.slane %v422_v43, 4  ;;  %v436_v56 = vrot.slane %v435_v20, 4 }
  0x54   : > { %v449_v6 = vrot.slane %v448_v44, 4  ;;  %v462_v28 = vrot.slane %v461_v50, 4  ;;  %v475_v26 = vrot.slane %v474_v29, 4  ;;  %v489_v51 = vadd.f32 %v488_v2, %v487_v8 }
  0x55   : > { %v398_v36 = vadd.f32 %v397_v52, %v396_v31  ;;  %v411_v38 = vadd.f32 %v410_v55, %v409_v40  ;;  %v424_v48 = vadd.f32 %v423_v16, %v422_v43  ;;  %v437_v14 = vadd.f32 %v436_v56, %v435_v20  ;;  %v261_v40 = vld [vmem:[#allocation2] sm:$0xff] }
  0x56   : > { %v450_v60 = vadd.f32 %v449_v6, %v448_v44  ;;  %v463_v45 = vadd.f32 %v462_v28, %v461_v50  ;;  %v476_v22 = vadd.f32 %v475_v26, %v474_v29  ;;  %v490_v25 = vrot.slane %v489_v51, 2 }
  0x57   : > { %v399_v57 = vrot.slane %v398_v36, 2  ;;  %v412_v41 = vrot.slane %v411_v38, 2  ;;  %v425_v30 = vrot.slane %v424_v48, 2  ;;  %v438_v0 = vrot.slane %v437_v14, 2 }
  0x58   : > { %v451_v58 = vrot.slane %v450_v60, 2  ;;  %v464_v27 = vrot.slane %v463_v45, 2  ;;  %v477_v10 = vrot.slane %v476_v22, 2  ;;  %v491_v54 = vadd.f32 %v490_v25, %v489_v51 }
  0x59   : > { %v400_v42 = vadd.f32 %v399_v57, %v398_v36  ;;  %v413_v53 = vadd.f32 %v412_v41, %v411_v38  ;;  %v426_v59 = vadd.f32 %v425_v30, %v424_v48  ;;  %v439_v13 = vadd.f32 %v438_v0, %v437_v14 }
  0x5a   : > { %v452_v12 = vadd.f32 %v451_v58, %v450_v60  ;;  %v465_v11 = vadd.f32 %v464_v27, %v463_v45  ;;  %v478_v62 = vadd.f32 %v477_v10, %v476_v22  ;;  %v492_v15 = vrot.slane %v491_v54, 1 }
  0x5b   : > { %v401_v1 = vrot.slane %v400_v42, 1  ;;  %v414_v3 = vrot.slane %v413_v53, 1  ;;  %v427_v39 = vrot.slane %v426_v59, 1  ;;  %v440_v46 = vrot.slane %v439_v13, 1 }
  0x5c   : > { %v453_v61 = vrot.slane %v452_v12, 1  ;;  %v466_v7 = vrot.slane %v465_v11, 1  ;;  %v479_v4 = vrot.slane %v478_v62, 1  ;;  %v493_v21 = vadd.f32 %v492_v15, %v491_v54 }
  0x5d   : > { %v402_v9 = vadd.f32 %v401_v1, %v400_v42  ;;  %v415_v23 = vadd.f32 %v414_v3, %v413_v53  ;;  %v428_v17 = vadd.f32 %v427_v39, %v426_v59  ;;  %v441_v35 = vadd.f32 %v440_v46, %v439_v13 }
  0x5e   : > { %v454_v18 = vadd.f32 %v453_v61, %v452_v12  ;;  %v467_v47 = vadd.f32 %v466_v7, %v465_v11  ;;  %v480_v49 = vadd.f32 %v479_v4, %v478_v62 }
  0x5f   : > { %v503_v63 = vsel %vm502_vm0, %v415_v23, %v402_v9 }
  0x60   : > { %v505_v34 = vsel %vm504_vm1, %v428_v17, %v503_v63 }
  0x61   : > { %v507_v31 = vsel %vm506_vm2, %v441_v35, %v505_v34 }
  0x62   : > { %v509_v32 = vsel %vm508_vm3, %v454_v18, %v507_v31 }
  0x63   : > { %v511_v24 = vsel %vm510_vm4, %v467_v47, %v509_v32 }
  0x64   : > { %v513_v43 = vsel %vm512_vm5, %v480_v49, %v511_v24  ;;  %522 = sbr.rel (%p780_p12) target bundleno = 814 (0x32e), region = 48 }
  0x65   : > { %v515_v5 = vsel %vm514_vm6, %v493_v21, %v513_v43 }
  0x66   : > { %v517_v20 = vadd.f32 %v515_v5, %v261_v40 }
  0x68   : > { %518 = vst [vmem:[#allocation2] sm:$0xff] %v517_v20 }
  0x69   : > { %v540_v19 = vld [vmem:[%s1606_s1 + $0x78] sm:$0xff]  ;;  %v1171_v44 = vmov 0.0   ;;  %v539_v33 = vld [vmem:[%s1606_s1 + $0x70] sm:$0xff]  ;;  %vm1172_vm7 = vmmov 0   ;;  %v538_v50 = vld [vmem:[%s1606_s1 + $0x68] sm:$0xff]  ;;  %vm618_vm8 = vcmask 23552   ;;  %v632_v30 = vlaneseq }
  0x6a   : > { %966 = vmatprep.subr.mxu0 %v1171_v44  ;;  %998 = vmatprep.mubr.msk.f32.mxu0 %vm1172_vm7, %v1171_v44  ;;  %v537_v37 = vld [vmem:[%s1606_s1 + $0x60] sm:$0xff]  ;;  %v536_v29 = vld [vmem:[%s1606_s1 + $0x58] sm:$0xff]  ;;  %v535_v8 = vld [vmem:[%s1606_s1 + $0x50] sm:$0xff]  ;;  %v1173_v41 = vmov 0   ;;  %vm655_vm12 = vcmask 7168   ;;  %vm664_vm14 = vcmask 0  }
  0x6b   : > { %967 = vmatpush3.msra.mxu0 %v540_v19  ;;  %v534_v52 = vld [vmem:[%s1606_s1 + $0x48] sm:$0xff]  ;;  %v533_v55 = vld [vmem:[%s1606_s1 + $0x40] sm:$0xff]  ;;  %v532_v16 = vld [vmem:[%s1606_s1 + $0x38] sm:$0xff]  ;;  %1066 = vset.pattern.permute.xlu1 %v1173_v41  ;;  %v633_v0 = vand.u32 127, %v632_v30 }
  0x6c   : > { %968 = vmatprep.subr.mxu0 %v1171_v44  ;;  %v531_v56 = vld [vmem:[%s1606_s1 + $0x30] sm:$0xff]  ;;  %v530_v6 = vld [vmem:[%s1606_s1 + $0x28] sm:$0xff]  ;;  %v529_v28 = vld [vmem:[%s1606_s1 + $0x20] sm:$0xff]  ;;  %1067 = vset.pattern.permute.xlu0 %v1173_v41 }
  0x6d   : > { %969 = vmatpush3.msra.mxu0 %v539_v33  ;;  %v528_v26 = vld [vmem:[%s1606_s1 + $0x18] sm:$0xff]  ;;  %v527_v2 = vld [vmem:[%s1606_s1 + $0x10] sm:$0xff]  ;;  %v526_v38 = vld [vmem:[%s1606_s1 + $0x8] sm:$0xff] }
  0x6e   : > { %970 = vmatprep.subr.mxu0 %v1171_v44  ;;  %v525_v48 = vld [vmem:[%s1606_s1] sm:$0xff] }
  0x6f   : > { %971 = vmatpush3.msra.mxu0 %v538_v50  ;;  %v523_v36 = vld [vmem:[#allocation2] sm:$0xff] }
  0x70   : > { %972 = vmatprep.subr.mxu0 %v1171_v44  ;;  %v524_v14 = vmul.f32 0.00625, %v523_v36  ;;  %v781_v60 = vld [vmem:[%s1607_s2] ss:$0 sm:$0xff] }
  0x71   : > { %973 = vmatpush3.msra.mxu0 %v537_v37  ;;  %v666_v11 = vld [vmem:[%s1608_s3] sm:$0xff] }
  0x72   : > { %974 = vmatprep.subr.mxu0 %v1171_v44 }
  0x73   : > { %975 = vmatpush3.msra.mxu0 %v536_v29 }
  0x74   : > { %976 = vmatprep.subr.mxu0 %v1171_v44 }
  0x75   : > { %977 = vmatpush3.msra.mxu0 %v535_v8 }
  0x76   : > { %978 = vmatprep.subr.mxu0 %v1171_v44 }
  0x77   : > { %979 = vmatpush3.msra.mxu0 %v534_v52 }
  0x78   : > { %980 = vmatprep.subr.mxu0 %v1171_v44 }
  0x79   : > { %981 = vmatpush3.msra.mxu0 %v533_v55 }
  0x7a   : > { %982 = vmatprep.subr.mxu0 %v1171_v44 }
  0x7b   : > { %983 = vmatpush3.msra.mxu0 %v532_v16 }
  0x7c   : > { %984 = vmatprep.subr.mxu0 %v1171_v44 }
  0x7d   : > { %985 = vmatpush3.msra.mxu0 %v531_v56 }
  0x7e   : > { %986 = vmatprep.subr.mxu0 %v1171_v44 }
  0x7f   : > { %987 = vmatpush3.msra.mxu0 %v530_v6 }
  0x80   : > { %988 = vmatprep.subr.mxu0 %v1171_v44 }
  0x81   : > { %989 = vmatpush3.msra.mxu0 %v529_v28 }
  0x82   : > { %990 = vmatprep.subr.mxu0 %v1171_v44 }
  0x83   : > { %991 = vmatpush3.msra.mxu0 %v528_v26 }
  0x84   : > { %992 = vmatprep.subr.mxu0 %v1171_v44 }
  0x85   : > { %993 = vmatpush3.msra.mxu0 %v527_v2 }
  0x86   : > { %994 = vmatprep.subr.mxu0 %v1171_v44 }
  0x87   : > { %995 = vmatpush3.msra.mxu0 %v526_v38 }
  0x88   : > { %996 = vmatprep.subr.mxu0 %v1171_v44 }
  0x89   : > { %997 = vmatpush3.msra.mxu0 %v525_v48 }
  0x8a   : > { %999 = vmatmul.mubr.f32.vlgmr.msra.gmra.mxu0 %v524_v14 }
 0x14a   : > { %v614_v45 = vpop.f32.mrf.mxu0 }
 0x14b   : > { %v615_v22 = vadd.f32 %v781_v60, %v614_v45 }
 0x14c   : > { %v1000_v51 = vpop.f32.mrf.mxu0 }
 0x14d   : > { %v619_v57 = vsel %vm618_vm8, %v615_v22, -inf }
 0x14e   : > { %620 = vmax.xlane.f32.xlu0 %v619_v57 }
 0x1d7   : > { %v621_v58 = vpop.xlane.xlu0 %620 }
 0x1d8   : > { %v622_v27 = vsub.f32 %v615_v22, %v621_v58  ;;  %vm634_vm9 = vcmp.ge.f32.partialorder %v615_v22, %v621_v58 }
 0x1d9   : > { %v635_v10 = vsel %vm634_vm9, %v633_v0, 3 }
 0x1da   : > { %v623_v25 = vmul.f32 1.442695, %v622_v27  ;;  %v636_v42 = vsel %vm618_vm8, %v635_v10, 2147483647 }
 0x1db   : > { %v638_v53 = vshra.s32 %v636_v42, 16  ;;  %v637_v62 = vand.u32 65535, %v636_v42 }
 0x1dc   : > { %1068 = vpow2.f32 %v623_v25 }
 0x1dd   : > { %v640_v59 = vcvt.s32.f32 %v638_v53  ;;  %v639_v1 = vcvt.s32.f32 %v637_v62 }
 0x1df   : > { %641 = vmin.xlane.f32.xlu1 %v640_v59 }
 0x1e9   : > { %v1069_v13 = vpop.eup %1068 }
 0x1ea   : > { %v625_v12 = vsel %vm618_vm8, %v1069_v13, 0.0 }
 0x1eb   : > { %626 = vadd.xlane.f32.xlu0 %v625_v12 }
 0x1f0   : > { %668 = vperm.xlu1 %1066, %v666_v11  }
 0x268   : > { %v642_v54 = vpop.xlane.xlu1 %641 }
 0x269   : > { %vm643_vm10 = vcmp.eq.f32.partialorder %v640_v59, %v642_v54  ;;  %v648_v35 = vcvt.f32.s32 %v642_v54 }
 0x26a   : > { %v644_v3 = vsel %vm643_vm10, %v639_v1, inf }
 0x26b   : > { %645 = vmin.xlane.f32.xlu0 %v644_v3  ;;  %v649_v47 = vshll.u32 %v648_v35, 16 }
 0x26c   : > { %v669_v7 = vpop.permute.xlu1 %668 }
 0x26d   : > { %vm670_vm11 = vcmp.eq.s32.totalorder %v633_v0, %v669_v7 }
 0x274   : > { %v627_v39 = vpop.xlane.xlu0 %626 }
 0x275   : > { %1070 = vlog2.f32 %v627_v39 }
 0x282   : > { %v1071_v46 = vpop.eup %1070 }
 0x283   : > { %v629_v61 = vmul.f32 0.6931472, %v1071_v46 }
 0x285   : > { %v630_v4 = vadd.f32 %v629_v61, %v621_v58 }
 0x287   : > { %v631_v15 = vsub.f32 %v615_v22, %v630_v4 }
 0x289   : > { %v671_v9 = vsel %vm670_vm11, %v631_v15, 0.0  ;;  %v675_v17 = vsel %vm618_vm8, %v631_v15, 0.0 }
 0x28a   : > { %v672_v23 = vsel %vm618_vm8, %v671_v9, 0.0 }
 0x28b   : > { %673 = vadd.xlane.f32.xlu0 %v672_v23 }
 0x28f   : > { %676 = vadd.xlane.f32.xlu0 %v675_v17 }
 0x2f4   : > { %v646_v18 = vpop.xlane.xlu0 %645 }
 0x2f5   : > { %v647_v63 = vcvt.f32.s32 %v646_v18 }
 0x2f7   : > { %v650_v49 = vadd.s32 %v649_v47, %v647_v63 }
 0x2f9   : > { %vm652_vm13 = vcmp.eq.s32.totalorder %v650_v49, %v666_v11 }
 0x2fa   : > { %v782_v34 = vsel %vm652_vm13, 1.0, %v1171_v44 }
 0x2fb   : > { %v656_v21 = vsel %vm655_vm12, %v782_v34, 0.0 }
 0x2fc   : > { %v657_v31 = vrot.slane %v656_v21, 4 }
 0x2fe   : > { %v658_v32 = vadd.f32 %v657_v31, %v656_v21 }
 0x300   : > { %v659_v40 = vrot.slane %v658_v32, 2 }
 0x302   : > { %v660_v24 = vadd.f32 %v659_v40, %v658_v32 }
 0x304   : > { %v661_v43 = vrot.slane %v660_v24, 1 }
 0x306   : > { %v662_v5 = vadd.f32 %v661_v43, %v660_v24 }
 0x308   : > { %v663_v20 = vmul.f32 0.125, %v662_v5 }
 0x30a   : > { %665 = vst.msk [vmem:[#allocation7] sm:$0x1] %vm664_vm14, %v663_v20 }
 0x314   : > { %v674_v19 = vpop.xlane.xlu0 %673 }
 0x315   : > { %v679_v50 = vmul.f32 0.85, %v674_v19 }
 0x318   : > { %v677_v33 = vpop.xlane.xlu0 %676 }
 0x319   : > { %v678_v37 = vmul.f32 0.05, %v677_v33 }
 0x31b   : > { %v680_v29 = vadd.f32 %v679_v50, %v678_v37 }
 0x31d   : > { %v681_v8 = vsub.f32 0.0, %v680_v29 }
 0x31f   : > { %v682_v52 = vrot.slane %v681_v8, 4 }
 0x321   : > { %v683_v55 = vadd.f32 %v682_v52, %v681_v8 }
 0x323   : > { %v684_v44 = vrot.slane %v683_v55, 2 }
 0x325   : > { %v685_v16 = vadd.f32 %v684_v44, %v683_v55 }
 0x327   : > { %v686_v56 = vrot.slane %v685_v16, 1 }
 0x329   : > { %v687_v6 = vadd.f32 %v686_v56, %v685_v16 }
 0x32b   : > { %v688_v28 = vmul.f32 1.25, %v687_v6 }
 0x32d   : > { %689 = vst.msk [vmem:[#allocation6] sm:$0x1] %vm664_vm14, %v688_v28 }
 0x32e PF: > { %p1018_p13 = scmp.eq.s32.totalorder %s1225_s22, 2  ;;  %s1174_s7 = smov [#allocation6]  }
 0x32f   : > { %s697_s8 = sshll.u32 %s1174_s7, 4  ;;  %s1175_s10 = smov [#allocation7]   ;;  %s698_s8 = int_to_ptr.vmem [resolvable:$true] %s697_s8 }
 0x330   : > { %s708_s11 = sshll.u32 %s1175_s10, 4  ;;  %s1072_s21 = scalar_lea.vmem %s698_s8, 16  ;;  %s709_s11 = int_to_ptr.vmem [resolvable:$true] %s708_s11 }
 0x331   : > { %p1073_p0 = scmp.ne.s32.totalorder %s698_s8, %s1072_s21  ;;  %s1078_s27 = scalar_lea.vmem %s698_s8, 32 }
 0x332   : > { %p1079_p3 = scmp.lt.s32.totalorder %s698_s8, %s698_s8  ;;  %p1080_p4 = scmp.lt.s32.totalorder %s1078_s27, %s1072_s21 }
 0x333   : > { %p1074_p1 = pnand %p1073_p0, %p1018_p13 }
 0x334   : > { %p1081_p5 = por %p1080_p4, %p1079_p3 }
 0x335   : > { %p1075_p2 = pneg %p1074_p1 }
 0x337   : > { %p1082_p6 = pnand %p1081_p5, %p1075_p2 }
 0x339   : > { %1085 = shalt.err (!%p1082_p6)
}
 0x33a   : > { %1011 = dma.vmem_to_hbm [thread:$0]  (%p1018_p13), %s698_s8, 16, %s1609_s4, [#allocation5]  }
 0x33b   : > { %s1096_s9 = scalar_lea.vmem %s709_s11, 16  ;;  %s1102_s12 = scalar_lea.vmem %s709_s11, 32 }
 0x33c   : > { %p1097_p7 = scmp.ne.s32.totalorder %s709_s11, %s1096_s9  ;;  %p1103_p10 = scmp.lt.s32.totalorder %s709_s11, %s709_s11 }
 0x33d   : > { %p1104_p11 = scmp.lt.s32.totalorder %s1102_s12, %s1096_s9 }
 0x33e   : > { %p1098_p8 = pnand %p1097_p7, %p1018_p13 }
 0x33f   : > { %p1105_p12 = por %p1104_p11, %p1103_p10 }
 0x340   : > { %p1099_p9 = pneg %p1098_p8 }
 0x342   : > { %p1106_p0 = pnand %p1105_p12, %p1099_p9 }
 0x344   : > { %1109 = shalt.err (!%p1106_p0)
}
 0x345   : > { %1013 = dma.vmem_to_hbm [thread:$0]  (%p1018_p13), %s709_s11, 16, %s1610_s5, [#allocation8]  }
 0x346   : > { %1141 = dma.done.wait (%p1018_p13), [#allocation5], 16  }
 0x347   : > { %1143 = vsyncadd (%p1018_p13), [#allocation5], 4294967280 }
 0x348   : > { %1145 = dma.done.wait (%p1018_p13), [#allocation8], 16  }
 0x349   : > { %1147 = vsyncadd (%p1018_p13), [#allocation8], 4294967280 }
 0x34a PF: > { %p18_p1 = scmp.ge.s32.totalorder %s1228_s23, 5   ;;  %s1641_s18 = smov %s1154_s19 }
 0x34b   : > { %s1642_s19 = smov %s1158_s20  ;;  %s1643_s20 = smov %s1238_s26 }
 0x34c   : > { %s1644_s21 = smov %s1228_s23  ;;  %20 = sbr.rel (!%p18_p1) target bundleno = 5 (0x5), region = 94 }
 0x351   :  { %725 = vsyncpa [#allocation4], 1 }
 0x352   :  { %727 = vsyncpa [#allocation4 + $0x1], 1 }
 0x353   :  { %728 = vsyncpa [#allocation5], 1 }
 0x354   :  { %730 = vsyncpa [#allocation5 + $0x1], 1 }
 0x355   :  { %731 = vsyncpa [#allocation8], 1 }

</bundles_post_ra>
